<compile_context>
chip_gen: v7x
topology: tpu7x:2x2x1
jax: 0.10.0
libtpu: 0.0.40
codegen_flags: <defaults>
</compile_context>

<pallas_src>
import functools
import math

import jax
import jax.numpy as jnp
from jax.experimental import pallas as pl
from jax.experimental.pallas import tpu as pltpu

_HALO = 8  # aligned halo rows stored before/after each L tile (must be >= k//2)


def _round_up(v, m):
    return (v + m - 1) // m * m


def _dwconv_kernel(x_ref, halo_ref, w_ref, b_ref, o_ref, win_ref, *,
                   kernel_size, pad, act):
    # x_ref   : (1, TL, C_in)            current L tile
    # halo_ref: (1, 1, 2*_HALO, C_in)    8 rows before + 8 rows after this tile
    # w_ref   : (k, C_in, C_out)         folded per-tap weights (dw[t] * pw)
    # b_ref   : (1, C_out)  fp32         fused bias (dwb @ pw + pwb)
    # o_ref   : (1, TL, C_out)
    # win_ref : (TL + 2*_HALO, C_in)     VMEM scratch holding the haloed window
    tl = x_ref.shape[1]

    if kernel_size > 1:
        # Assemble the haloed window with tile-aligned (8-row) stores.
        h = halo_ref[0, 0]                               # (16, C_in)
        win_ref[0:_HALO, :] = h[0:_HALO, :]
        win_ref[_HALO:_HALO + tl, :] = x_ref[0]
        win_ref[_HALO + tl:, :] = h[_HALO:, :]

    # Depthwise + pointwise fused: k accumulating MXU matmuls over shifted windows.
    base = _HALO - pad
    out = None
    for t in range(kernel_size):
        # Center tap is exactly the (aligned) input tile; edge taps read the haloed window.
        lhs = x_ref[0] if t == pad else win_ref[pl.ds(base + t, tl), :]
        part = jnp.dot(lhs, w_ref[t], preferred_element_type=jnp.float32)
        out = part if out is None else out + part
    out = out + b_ref[0][None, :]                        # fused (dwb@pw + pwb), fp32

    if act == "relu":
        out = jnp.maximum(out, 0.0)
    elif act == "gelu":
        # Matches the module's custom tanh-approximation gelu().
        c = math.sqrt(2.0 / math.pi)
        out = 0.5 * out * (1.0 + jnp.tanh(c * (out + 0.044715 * out * out * out)))

    o_ref[0] = out.astype(o_ref.dtype)


def dwconv_forward(x, dw_weight, dw_bias, pw_weight, pw_bias, *, kernel_size,
                   act="relu", tile_l=None):
    """DWConv forward: x (B, L, C_in) -> (B, L, C_out).

    Weight layouts (already transposed from PyTorch):
      dw_weight: (k, C_in)      [torch depthwise.weight (C_in, 1, k)]
      dw_bias  : (C_in,) or None
      pw_weight: (C_in, C_out)  [torch pointwise.weight (C_out, C_in, 1)]
      pw_bias  : (C_out,) or None
    """
    B, L, C_in = x.shape
    k = int(kernel_size)
    # TODO(synk): even kernel_size changes the output length in the PyTorch module
    # (padding=k//2, L -> L+1); only the usual odd-k "same" case is implemented here.
    assert k % 2 == 1, "kernel_size must be odd"
    pad = k // 2
    assert pad <= _HALO, "kernel_size too large for the fixed 8-row halo"
    C_out = pw_weight.shape[1]
    dtype = x.dtype
    itemsize = dtype.itemsize

    # Lane-dense channel padding (multiples of 128).
    c_in_p = _round_up(C_in, 128)
    c_out_p = _round_up(C_out, 128)

    # MXU dtype: keep bf16 end-to-end when activations are bf16, else fp32.
    w_dtype = jnp.bfloat16 if dtype == jnp.bfloat16 else jnp.float32
    wsize = 2 if w_dtype == jnp.bfloat16 else 4

    # Generation-aware VMEM cap (v5e/v6e: 128 MiB physical, v7x: 64 MiB).
    try:
        phys_vmem = int(pltpu.get_tpu_info().vmem_capacity_bytes)
    except Exception:
        phys_vmem = 64 * 1024 * 1024  # conservative fallback (v7x-sized)
    limit_cap = int(min(64 * 1024 * 1024, phys_vmem * 3 // 5))

    def work_bytes(t):
        return (2 * t * c_in_p * itemsize                 # x tiles (double-buffered)
                + 2 * t * c_out_p * itemsize               # out tiles (double-buffered)
                + 2 * 2 * _HALO * c_in_p * itemsize        # halo tiles (double-buffered)
                + 2 * k * c_in_p * c_out_p * wsize         # folded weights (count x2 buffers)
                + 2 * c_out_p * 4                          # fused bias
                + (t + 2 * _HALO) * c_in_p * itemsize      # window scratch
                + t * c_out_p * 4)                         # fp32 accumulator temporaries

    # L tile: largest multiple of 8 (<= 4096) whose working set stays within half the cap.
    if tile_l is None:
        tile_l = min(4096, _round_up(L, 8))
        budget = limit_cap // 2
        while tile_l > 8 and work_bytes(tile_l) > budget:
            tile_l = max(8, (tile_l // 2) // 8 * 8)
    tl = max(8, _round_up(min(tile_l, _round_up(L, 8)), 8))
    nt = pl.cdiv(L, tl)
    l_round = nt * tl
    vmem_limit = int(min(limit_cap, max(16 * 1024 * 1024, 2 * work_bytes(tl))))

    # Zero-pad x only when needed (skip the wrapper HBM pass for aligned shapes).
    if l_round == L and c_in_p == C_in:
        xp = x
    else:
        xp = jnp.pad(x, ((0, 0), (0, l_round - L), (0, c_in_p - C_in)))

    # Fold depthwise into the pointwise matmul: W_t = dw[t] (.) pw, bias = dwb@pw + pwb.
    dw_f = dw_weight.astype(jnp.float32)
    pw_f = pw_weight.astype(jnp.float32)
    dwb_f = jnp.zeros((C_in,), jnp.float32) if dw_bias is None else dw_bias.astype(jnp.float32)
    pwb_f = jnp.zeros((C_out,), jnp.float32) if pw_bias is None else pw_bias.astype(jnp.float32)
    w_fold = dw_f[:, :, None] * pw_f[None, :, :]          # (k, C_in, C_out)
    b_fold = dwb_f @ pw_f + pwb_f                         # (C_out,)
    if c_in_p != C_in or c_out_p != C_out:
        w_fold = jnp.pad(w_fold, ((0, 0), (0, c_in_p - C_in), (0, c_out_p - C_out)))
        b_fold = jnp.pad(b_fold, (0, c_out_p - C_out))
    w_fold = w_fold.astype(w_dtype)
    b_fold = b_fold.reshape(1, c_out_p).astype(jnp.float32)

    # Tiny halo side-input: 8 rows before + 8 rows after each tile (zeros at sequence ends).
    tiles = xp.reshape(B, nt, tl, c_in_p)
    zblk = jnp.zeros((B, 1, _HALO, c_in_p), dtype)
    if nt > 1:
        pre = jnp.concatenate([zblk, tiles[:, :-1, tl - _HALO:, :]], axis=1)
        post = jnp.concatenate([tiles[:, 1:, :_HALO, :], zblk], axis=1)
    else:
        pre, post = zblk, zblk
    halo = jnp.concatenate([pre, post], axis=2)            # (B, NT, 16, C_in_p)

    kernel = functools.partial(_dwconv_kernel, kernel_size=k, pad=pad, act=act)

    out_p = pl.pallas_call(
        kernel,
        out_shape=jax.ShapeDtypeStruct((B, l_round, c_out_p), dtype),
        grid_spec=pltpu.PrefetchScalarGridSpec(
            num_scalar_prefetch=0,
            grid=(B, nt),
            in_specs=[
                pl.BlockSpec((1, tl, c_in_p), lambda b, i: (b, i, 0)),
                pl.BlockSpec((1, 1, 2 * _HALO, c_in_p), lambda b, i: (b, i, 0, 0)),
                pl.BlockSpec((k, c_in_p, c_out_p), lambda b, i: (0, 0, 0)),
                pl.BlockSpec((1, c_out_p), lambda b, i: (0, 0)),
            ],
            out_specs=pl.BlockSpec((1, tl, c_out_p), lambda b, i: (b, i, 0)),
            scratch_shapes=[pltpu.VMEM((tl + 2 * _HALO, c_in_p), dtype)],
        ),
        compiler_params=pltpu.CompilerParams(
            dimension_semantics=("parallel", "parallel"),
            vmem_limit_bytes=vmem_limit),
    )(xp, halo, w_fold, b_fold)

    if l_round == L and c_out_p == C_out:
        return out_p
    return out_p[:, :L, :C_out]


def dwconv_reference(x, dw_weight, dw_bias, pw_weight, pw_bias, kernel_size, act="relu"):
    """Pure-JAX reference mirroring the PyTorch module (unfused, for independent checking)."""
    pad = kernel_size // 2
    B, L, C = x.shape
    xp = jnp.pad(x, ((0, 0), (pad, pad), (0, 0))).astype(jnp.float32)
    acc = jnp.zeros((B, L, C), jnp.float32)
    for t in range(kernel_size):
        acc = acc + xp[:, t:t + L, :] * dw_weight[t].astype(jnp.float32)[None, None, :]
    acc = acc + dw_bias.astype(jnp.float32)[None, None, :]
    out = jnp.einsum("blc,cd->bld", acc, pw_weight.astype(jnp.float32))
    out = out + pw_bias.astype(jnp.float32)[None, None, :]
    if act == "relu":
        out = jnp.maximum(out, 0.0)
    elif act == "gelu":
        c = math.sqrt(2.0 / math.pi)
        out = 0.5 * out * (1.0 + jnp.tanh(c * (out + 0.044715 * out ** 3)))
    return out.astype(x.dtype)


if __name__ == "__main__":
    # Small shapes consistent with the module's forward (defaults: bias=True, act='relu').
    B, L = 2, 16
    nin, nout, kernel_size = 32, 64, 3

    key = jax.random.PRNGKey(0)
    kx, kdw, kdb, kpw, kpb = jax.random.split(key, 5)

    x = jax.random.normal(kx, (B, L, nin), jnp.float32)
    # PyTorch layouts: depthwise.weight (nin, 1, k) -> stored here as (k, nin);
    #                  pointwise.weight (nout, nin, 1) -> stored here as (nin, nout).
    dw_weight = jax.random.normal(kdw, (kernel_size, nin), jnp.float32) * 0.1
    dw_bias = jax.random.normal(kdb, (nin,), jnp.float32) * 0.1
    pw_weight = jax.random.normal(kpw, (nin, nout), jnp.float32) * 0.1
    pw_bias = jax.random.normal(kpb, (nout,), jnp.float32) * 0.1

    out = dwconv_forward(x, dw_weight, dw_bias, pw_weight, pw_bias,
                         kernel_size=kernel_size, act="relu")
    out = jax.block_until_ready(out)

    ref = dwconv_reference(x, dw_weight, dw_bias, pw_weight, pw_bias,
                           kernel_size, act="relu")
    assert out.shape == (B, L, nout)
    assert jnp.allclose(out, ref, atol=1e-3, rtol=1e-3), "mismatch vs reference"

    print("KERNEL_OK")
</pallas_src>

<mosaic_0001>
module attributes {stable_mosaic.version = 11 : i64} {
  func.func @_dwconv_kernel(%arg0: i32, %arg1: i32, %arg2: memref<1x16x128xf32, #tpu.memory_space<vmem>>, %arg3: memref<1x1x16x128xf32, #tpu.memory_space<vmem>>, %arg4: memref<3x128x128xf32, #tpu.memory_space<vmem>>, %arg5: memref<1x128xf32, #tpu.memory_space<vmem>>, %arg6: memref<1x16x128xf32, #tpu.memory_space<vmem>>, %arg7: memref<32x128xf32, #tpu.memory_space<vmem>>) attributes {dimension_semantics = [#tpu.dimension_semantics<parallel>, #tpu.dimension_semantics<parallel>], iteration_bounds = array<i64: 2, 1>, scalar_prefetch = 0 : i64, scratch_operands = 1 : i64, tpu.core_type = #tpu.core_type<tc>, window_params = [{transform_indices = @transform_0, window_bounds = array<i64: 1, 16, 128>}, {transform_indices = @transform_1, window_bounds = array<i64: 1, 1, 16, 128>}, {pipeline_mode = #tpu.pipeline_mode<synchronous>, transform_indices = @transform_2, window_bounds = array<i64: 3, 128, 128>}, {pipeline_mode = #tpu.pipeline_mode<synchronous>, transform_indices = @transform_3, window_bounds = array<i64: 1, 128>}, {transform_indices = @transform_4, window_bounds = array<i64: 1, 16, 128>}]} {
    %c0 = arith.constant 0 : index
    %c0_0 = arith.constant 0 : index
    %c0_1 = arith.constant 0 : index
    %c0_2 = arith.constant 0 : index
    %0 = vector.load %arg3[%c0, %c0_0, %c0_1, %c0_2] : memref<1x1x16x128xf32, #tpu.memory_space<vmem>>, vector<1x1x16x128xf32>
    %1 = vector.shape_cast %0 : vector<1x1x16x128xf32> to vector<16x128xf32>
    %2 = vector.extract_strided_slice %1 {offsets = [0, 0], sizes = [8, 128], strides = [1, 1]} : vector<16x128xf32> to vector<8x128xf32>
    %c0_3 = arith.constant 0 : index
    %c0_4 = arith.constant 0 : index
    %3 = vector.load %arg7[%c0_3, %c0_4] : memref<32x128xf32, #tpu.memory_space<vmem>>, vector<8x128xf32>
    tpu.vector_store %arg7[%c0_3, %c0_4], %2 {strides = array<i32>} : memref<32x128xf32, #tpu.memory_space<vmem>>, vector<8x128xf32>,
    %c0_5 = arith.constant 0 : index
    %c0_6 = arith.constant 0 : index
    %c0_7 = arith.constant 0 : index
    %4 = vector.load %arg2[%c0_5, %c0_6, %c0_7] : memref<1x16x128xf32, #tpu.memory_space<vmem>>, vector<1x16x128xf32>
    %5 = vector.shape_cast %4 : vector<1x16x128xf32> to vector<16x128xf32>
    %c8 = arith.constant 8 : index
    %c0_8 = arith.constant 0 : index
    %6 = vector.load %arg7[%c8, %c0_8] : memref<32x128xf32, #tpu.memory_space<vmem>>, vector<16x128xf32>
    tpu.vector_store %arg7[%c8, %c0_8], %5 {strides = array<i32>} : memref<32x128xf32, #tpu.memory_space<vmem>>, vector<16x128xf32>,
    %7 = vector.extract_strided_slice %1 {offsets = [8, 0], sizes = [8, 128], strides = [1, 1]} : vector<16x128xf32> to vector<8x128xf32>
    %c24 = arith.constant 24 : index
    %c0_9 = arith.constant 0 : index
    %8 = vector.load %arg7[%c24, %c0_9] : memref<32x128xf32, #tpu.memory_space<vmem>>, vector<8x128xf32>
    tpu.vector_store %arg7[%c24, %c0_9], %7 {strides = array<i32>} : memref<32x128xf32, #tpu.memory_space<vmem>>, vector<8x128xf32>,
    %c7 = arith.constant 7 : index
    %c0_10 = arith.constant 0 : index
    %9 = vector.load %arg7[%c7, %c0_10] : memref<32x128xf32, #tpu.memory_space<vmem>>, vector<16x128xf32>
    %c0_11 = arith.constant 0 : index
    %c0_12 = arith.constant 0 : index
    %c0_13 = arith.constant 0 : index
    %10 = vector.load %arg4[%c0_11, %c0_12, %c0_13] : memref<3x128x128xf32, #tpu.memory_space<vmem>>, vector<1x128x128xf32>
    %11 = vector.shape_cast %10 : vector<1x128x128xf32> to vector<128x128xf32>
    %cst = arith.constant dense<0.000000e+00> : vector<16x128xf32>
    %12 = tpu.matmul %9, %11, %cst {dimension_numbers = #tpu.dot_dimension_numbers<[1], [0], [0], [1], [0, 0, 1, 1], [], []>} : vector<16x128xf32>, vector<128x128xf32>, vector<16x128xf32> -> vector<16x128xf32>
    %c0_14 = arith.constant 0 : index
    %c0_15 = arith.constant 0 : index
    %c0_16 = arith.constant 0 : index
    %13 = vector.load %arg2[%c0_14, %c0_15, %c0_16] : memref<1x16x128xf32, #tpu.memory_space<vmem>>, vector<1x16x128xf32>
    %14 = vector.shape_cast %13 : vector<1x16x128xf32> to vector<16x128xf32>
    %c1 = arith.constant 1 : index
    %c0_17 = arith.constant 0 : index
    %c0_18 = arith.constant 0 : index
    %15 = vector.load %arg4[%c1, %c0_17, %c0_18] : memref<3x128x128xf32, #tpu.memory_space<vmem>>, vector<1x128x128xf32>
    %16 = vector.shape_cast %15 : vector<1x128x128xf32> to vector<128x128xf32>
    %cst_19 = arith.constant dense<0.000000e+00> : vector<16x128xf32>
    %17 = tpu.matmul %14, %16, %cst_19 {dimension_numbers = #tpu.dot_dimension_numbers<[1], [0], [0], [1], [0, 0, 1, 1], [], []>} : vector<16x128xf32>, vector<128x128xf32>, vector<16x128xf32> -> vector<16x128xf32>
    %18 = arith.addf %12, %17 : vector<16x128xf32>
    %c9 = arith.constant 9 : index
    %c0_20 = arith.constant 0 : index
    %19 = vector.load %arg7[%c9, %c0_20] : memref<32x128xf32, #tpu.memory_space<vmem>>, vector<16x128xf32>
    %c2 = arith.constant 2 : index
    %c0_21 = arith.constant 0 : index
    %c0_22 = arith.constant 0 : index
    %20 = vector.load %arg4[%c2, %c0_21, %c0_22] : memref<3x128x128xf32, #tpu.memory_space<vmem>>, vector<1x128x128xf32>
    %21 = vector.shape_cast %20 : vector<1x128x128xf32> to vector<128x128xf32>
    %cst_23 = arith.constant dense<0.000000e+00> : vector<16x128xf32>
    %22 = tpu.matmul %19, %21, %cst_23 {dimension_numbers = #tpu.dot_dimension_numbers<[1], [0], [0], [1], [0, 0, 1, 1], [], []>} : vector<16x128xf32>, vector<128x128xf32>, vector<16x128xf32> -> vector<16x128xf32>
    %23 = arith.addf %18, %22 : vector<16x128xf32>
    %c0_24 = arith.constant 0 : index
    %c0_25 = arith.constant 0 : index
    %24 = vector.load %arg5[%c0_24, %c0_25] : memref<1x128xf32, #tpu.memory_space<vmem>>, vector<1x128xf32>
    %25 = vector.shape_cast %24 : vector<1x128xf32> to vector<128xf32>
    %26 = vector.shape_cast %25 : vector<128xf32> to vector<1x128xf32>
    %27 = vector.broadcast %26 : vector<1x128xf32> to vector<16x128xf32>
    %28 = arith.addf %23, %27 : vector<16x128xf32>
    %cst_26 = arith.constant 0.000000e+00 : f32
    %29 = vector.broadcast %cst_26 : f32 to vector<16x128xf32>
    %30 = arith.maximumf %28, %29 : vector<16x128xf32>
    %c0_27 = arith.constant 0 : index
    %c0_28 = arith.constant 0 : index
    %c0_29 = arith.constant 0 : index
    %31 = vector.load %arg6[%c0_27, %c0_28, %c0_29] : memref<1x16x128xf32, #tpu.memory_space<vmem>>, vector<1x16x128xf32>
    %32 = vector.shape_cast %31 : vector<1x16x128xf32> to vector<16x128xf32>
    %33 = vector.shape_cast %30 : vector<16x128xf32> to vector<1x16x128xf32>
    tpu.vector_store %arg6[%c0_27, %c0_28, %c0_29], %33 {strides = array<i32>} : memref<1x16x128xf32, #tpu.memory_space<vmem>>, vector<1x16x128xf32>,
    return
  }
  func.func @transform_0(%arg0: i32, %arg1: i32) -> (i32, i32, i32) {
    %c0_i32 = arith.constant 0 : i32
    %c0_i32_0 = arith.constant 0 : i32
    return %arg0, %arg1, %c0_i32 : i32, i32, i32
  }
  func.func @transform_1(%arg0: i32, %arg1: i32) -> (i32, i32, i32, i32) {
    %c0_i32 = arith.constant 0 : i32
    %c0_i32_0 = arith.constant 0 : i32
    %c0_i32_1 = arith.constant 0 : i32
    return %arg0, %arg1, %c0_i32, %c0_i32_0 : i32, i32, i32, i32
  }
  func.func @transform_2(%arg0: i32, %arg1: i32) -> (i32, i32, i32) {
    %c0_i32 = arith.constant 0 : i32
    %c0_i32_0 = arith.constant 0 : i32
    %c0_i32_1 = arith.constant 0 : i32
    %c0_i32_2 = arith.constant 0 : i32
    return %c0_i32, %c0_i32_0, %c0_i32_1 : i32, i32, i32
  }
  func.func @transform_3(%arg0: i32, %arg1: i32) -> (i32, i32) {
    %c0_i32 = arith.constant 0 : i32
    %c0_i32_0 = arith.constant 0 : i32
    %c0_i32_1 = arith.constant 0 : i32
    return %c0_i32, %c0_i32_0 : i32, i32
  }
  func.func @transform_4(%arg0: i32, %arg1: i32) -> (i32, i32, i32) {
    %c0_i32 = arith.constant 0 : i32
    %c0_i32_0 = arith.constant 0 : i32
    return %arg0, %arg1, %c0_i32 : i32, i32, i32
  }
}

</mosaic_0001>

<bundles_post_ra>
// kernel: tpu_custom_call.1
= control target key start
LH: loop header
LB: loop body
LE: loop exit
PB: predicated region body
PF: predicated region fallthrough
CT: control target
= control target key end

     0   :  { %s1601_s0 = inlined_call_operand.hbm [shape: f32[2,16,128], index: 0, kind: input, shape index: {}]   ;;  %s1602_s1 = inlined_call_operand.hbm [shape: f32[2,1,16,128], index: 1, kind: input, shape index: {}]   ;;  %s1603_s2 = inlined_call_operand.hbm [shape: f32[3,128,128], index: 2, kind: input, shape index: {}]   ;;  %s1604_s3 = inlined_call_operand.vmem [shape: f32[1,128], index: 3, kind: input, shape index: {}]   ;;  %s1605_s4 = inlined_call_operand.hbm [shape: f32[2,16,128], index: 4, kind: output, shape index: {}]  }
   0x1   :  { %1614 = sst [smem:[#allocation15_spill]] %s1601_s0 }
   0x2   :  { %1615 = sst [smem:[#allocation16_spill]] %s1603_s2 }
   0x3   :  { %9 = vsyncpa [#allocation4], 0 }
   0x4   :  { %11 = vsyncpa [#allocation4 + $0x1], 0 }
   0x5   :  { %12 = vsyncpa [#allocation7], 0 }
   0x6   :  { %14 = vsyncpa [#allocation7 + $0x1], 0 }
   0x7   :  { %15 = vsyncpa [#allocation5], 0 }
   0x8   :  { %17 = vsyncpa [#allocation5 + $0x1], 0  ;;  %s1315_s15 = smov 0   ;;  %s1317_s16 = smov 0  }
   0x9   :  { %s1319_s17 = smov 0   ;;  %s1321_s18 = smov 0  }
   0xa   :  { %s1323_s19 = smov 0   ;;  %s1325_s20 = smov 0  }
   0xb LB: > { %s1346_s21 = sadd.s32 4294967295, %s1280_s20   ;;  %s737_s22 = sadd.s32 4294967294, %s1280_s20   ;;  %s1280_s20 = sphi %s1325_s20, %s23_s20   ;;  %s1276_s19 = sphi %s1323_s19, %s1640_s19   ;;  %s1272_s18 = sphi %s1321_s18, %s1639_s18   ;;  %s1268_s17 = sphi %s1319_s17, %s1638_s17   ;;  %s1264_s16 = sphi %s1317_s16, %s1637_s16   ;;  %s1260_s15 = sphi %s1315_s15, %s1636_s15  }
   0xc   : > { %p57_p0 = scmp.ne.s32.totalorder %s1264_s16, %s1260_s15  ;;  %p1606_p1 = scmp.eq.s32.totalorder %s1346_s21, 0 }
   0xd   : > { %p159_p3 = scmp.eq.s32.totalorder %s737_s22, 1  ;;  %p738_p5 = scmp.ge.s32.totalorder %s1280_s20, 1 }
   0xe   : > { %p1355_p4 = por %p1606_p1, %p57_p0  ;;  %p166_p7 = scmp.lt.s32.totalorder %s1280_s20, 3 }
   0xf   : > { %p1360_p6 = por %p159_p3, %p57_p0  ;;  %s1282_s26 = smov [#allocation8]  }
  0x10   : > { %s1616_s23 = scalar_select %p1355_p4, 1, 0 }
  0x11   : > { %s1617_s24 = scalar_select %p1360_p6, 1, 0 }
  0x12   : > { %p1365_p8 = pnand %p738_p5, %p166_p7  ;;  %s178_s27 = sshll.u32 %s1282_s26, 4  ;;  %s179_s27 = int_to_ptr.vmem [resolvable:$true] %s178_s27 }
  0x13   : > { %s35_s29 = sadd.s32 1, %s1276_s19  ;;  %s1620_s2 = sld [smem:[#allocation16_spill]] }
  0x14   : > { %s1618_s25 = scalar_select %p1365_p8, 1, 0 }
  0x15   : > { %p1030_p9 = pneg %p1365_p8 }
  0x17   : > { %p1374_p11 = pnand %p1030_p9, %p1606_p1 }
  0x19   : > { %s1102_s6 = scalar_lea.hbm %s1620_s2, 6144  ;;  %p1104_p13 = pneg %p1374_p11 }
  0x1a   : > { %p1103_p12 = scmp.ne.s32.totalorder %s1620_s2, %s1102_s6  ;;  %p1109_p5 = scmp.lt.u32.totalorder %s1102_s6, %s1620_s2 }
  0x1c   : > { %p1105_p0 = pnand %p1104_p13, %p1103_p12 }
  0x1e   : > { %p1106_p3 = pneg %p1105_p0 }
  0x20   : > { %p1111_p7 = pnand %p1109_p5, %p1106_p3 }
  0x22   : > { %1114 = shalt.err (!%p1111_p7)
}
  0x23   : > { %s1115_s11 = scalar_lea.vmem %s179_s27, 6144  ;;  %p1123_p2 = scmp.lt.s32.totalorder %s179_s27, %s179_s27 }
  0x24   : > { %p1116_p9 = scmp.ne.s32.totalorder %s179_s27, %s1115_s11  ;;  %p1124_p6 = scmp.lt.s32.totalorder %s1115_s11, %s1115_s11 }
  0x26   : > { %p1118_p10 = pnand %p1116_p9, %p1104_p13  ;;  %p1125_p4 = por %p1124_p6, %p1123_p2 }
  0x28   : > { %p1119_p1 = pneg %p1118_p10 }
  0x2a   : > { %p1126_p8 = pnand %p1125_p4, %p1119_p1 }
  0x2c   : > { %1129 = shalt.err (!%p1126_p8)
}
  0x2d   : > { %s1609_s12 = smov 128   ;;  %s1611_s13 = smov 8  }
  0x2e   : > { %1033 = dma.hbm_to_vmem [thread:$0]  (!%p1374_p11), %s1620_s2, 6144, %s179_s27, [#allocation7], %s1609_s12, %s1609_s12, %s1611_s13  }
  0x2f   : > { %p37_p1 = scmp.ge.s32.totalorder %s35_s29, 2  ;;  %s44_s26 = sadd.s32 1, %s1268_s17 }
  0x30   : > { %p51_p2 = scmp.ne.s32.totalorder %s1268_s17, %s1264_s16  ;;  %p52_p4 = scmp.eq.s32.totalorder %s1280_s20, 0 }
  0x31   : > { %s1642_s29 = smov (%p37_p1, %s35_s29), 0  ;;  %p1623_p8 = scmp.eq.s32.totalorder %s1346_s21, 1 }
  0x32   : > { %1621 = sst [smem:[#allocation14_spill]] %s1642_s29  ;;  %p1404_p6 = por %p52_p4, %p51_p2 }
  0x33   : > { %p1410_p10 = por %p1623_p8, %p51_p2  ;;  %s39_s5 = ssub.s32 %s1276_s19, %s1642_s29 }
  0x34   : > { %p1046_p12 = scmp.lt.s32.totalorder %s1280_s20, 2  ;;  %p42_p11 = scmp.eq.s32.totalorder %s39_s5, 0 }
  0x35   : > { %s195_s27 = sand.u32 1, %s1268_s17   ;;  %s758_s8 = sshll.u32 %s1276_s19, 8 }
  0x36   : > { %s741_s6 = sshll.u32 %s195_s27, 4  ;;  %s1625_s0 = sld [smem:[#allocation15_spill]] }
  0x37   : > { %s1419_s7 = scalar_select %p42_p11, %s1268_s17, %s44_s26  }
  0x38   : > { %s199_s14 = scalar_lea.vmem [#allocation3], %s741_s6  ;;  %p1431_p13 = pnand %p1046_p12, %p1404_p6 }
  0x39   : > { %s208_s22 = sshll.u32 %s199_s14, 4  ;;  %s1438_s9 = scalar_lea.hbm %s1602_s1, %s758_s8  ;;  %s1427_s22 = int_to_ptr.vmem [resolvable:$true] %s208_s22 }
  0x3a   : > { %s222_s10 = scalar_lea.vmem [#allocation6], %s741_s6  ;;  %s1442_s2 = scalar_lea.sflag [#allocation4], %s195_s27 }
  0x3b   : > { %s1440_s13 = sshll.u32 %s222_s10, 4  ;;  %p1132_p3 = pneg %p1431_p13  ;;  %s1474_s13 = int_to_ptr.vmem [resolvable:$true] %s1440_s13 }
  0x3c   : > { %s1425_s11 = scalar_lea.hbm %s1625_s0, %s758_s8  ;;  %s1135_s12 = scalar_lea.hbm %s1625_s0, 512 }
  0x3d   : > { %s1130_s14 = scalar_lea.hbm %s1425_s11, 256  ;;  %p1136_p9 = scmp.lt.u32.totalorder %s1425_s11, %s1625_s0 }
  0x3e   : > { %p1131_p0 = scmp.ne.s32.totalorder %s1425_s11, %s1130_s14  ;;  %p1137_p1 = scmp.lt.u32.totalorder %s1135_s12, %s1130_s14 }
  0x3f   : > { %p1139_p4 = scmp.lt.u32.totalorder %s1130_s14, %s1425_s11 }
  0x40   : > { %p1133_p5 = pnand %p1132_p3, %p1131_p0  ;;  %p1138_p2 = por %p1137_p1, %p1136_p9 }
  0x42   : > { %p1134_p7 = pneg %p1133_p5  ;;  %p1140_p6 = por %p1139_p4, %p1138_p2 }
  0x44   : > { %p1141_p8 = pnand %p1140_p6, %p1134_p7 }
  0x46   : > { %1144 = shalt.err (!%p1141_p8)
}
  0x47   : > { %s1145_s27 = scalar_lea.vmem %s1427_s22, 256  ;;  %s1285_s29 = smov [#allocation3]  }
  0x48   : > { %p1146_p12 = scmp.ne.s32.totalorder %s1427_s22, %s1145_s27  ;;  %s1150_s6 = sshll.u32 %s1285_s29, 4  ;;  %s1151_s6 = int_to_ptr.vmem [resolvable:$false] %s1150_s6 }
  0x49   : > { %s1152_s10 = scalar_lea.vmem %s1151_s6, 512  ;;  %p1153_p5 = scmp.lt.s32.totalorder %s1427_s22, %s1151_s6 }
  0x4a   : > { %p1148_p11 = pnand %p1146_p12, %p1132_p3  ;;  %p1154_p9 = scmp.lt.s32.totalorder %s1152_s10, %s1145_s27 }
  0x4c   : > { %p1149_p0 = pneg %p1148_p11  ;;  %p1155_p1 = por %p1154_p9, %p1153_p5 }
  0x4e   : > { %p1156_p2 = pnand %p1155_p1, %p1149_p0 }
  0x50   : > { %1159 = shalt.err (!%p1156_p2)
}
  0x51   : > { %s1627_s14 = smov 8   ;;  %s1628_s30 = smov 128  }
  0x52   : > { %1037 = dma.hbm_to_vmem [thread:$0]  (!%p1431_p13), %s1425_s11, 256, %s1427_s22, %s1442_s2, %s1628_s30, %s1628_s30, %s1627_s14  }
  0x53   : > { %s218_s12 = sand.u32 1, %s1280_s20   ;;  %s1160_s8 = scalar_lea.hbm %s1438_s9, 256 }
  0x54   : > { %s1477_s26 = scalar_lea.sflag [#allocation7], %s218_s12  ;;  %p1161_p7 = scmp.ne.s32.totalorder %s1438_s9, %s1160_s8 }
  0x55   : > { %s1165_s6 = scalar_lea.hbm %s1602_s1, 512  ;;  %p1166_p8 = scmp.lt.u32.totalorder %s1438_s9, %s1602_s1 }
  0x56   : > { %p1163_p4 = pnand %p1161_p7, %p1132_p3  ;;  %p1167_p12 = scmp.lt.u32.totalorder %s1165_s6, %s1160_s8 }
  0x57   : > { %p1169_p0 = scmp.lt.u32.totalorder %s1160_s8, %s1438_s9 }
  0x58   : > { %p1164_p6 = pneg %p1163_p4  ;;  %p1168_p11 = por %p1167_p12, %p1166_p8 }
  0x5a   : > { %p1170_p5 = por %p1169_p0, %p1168_p11 }
  0x5c   : > { %p1171_p9 = pnand %p1170_p5, %p1164_p6 }
  0x5e   : > { %1174 = shalt.err (!%p1171_p9)
}
  0x5f   : > { %s1175_s2 = scalar_lea.vmem %s1474_s13, 256  ;;  %s1286_s11 = smov [#allocation6]  }
  0x60   : > { %p1176_p1 = scmp.ne.s32.totalorder %s1474_s13, %s1175_s2  ;;  %s1180_s22 = sshll.u32 %s1286_s11, 4  ;;  %s1181_s22 = int_to_ptr.vmem [resolvable:$false] %s1180_s22 }
  0x61   : > { %s1182_s0 = scalar_lea.vmem %s1181_s22, 512  ;;  %p1183_p4 = scmp.lt.s32.totalorder %s1474_s13, %s1181_s22 }
  0x62   : > { %p1178_p2 = pnand %p1176_p1, %p1132_p3  ;;  %p1184_p8 = scmp.lt.s32.totalorder %s1182_s0, %s1175_s2 }
  0x64   : > { %p1179_p7 = pneg %p1178_p2  ;;  %p1185_p12 = por %p1184_p8, %p1183_p4 }
  0x66   : > { %p1186_p11 = pnand %p1185_p12, %p1179_p7 }
  0x68   : > { %1189 = shalt.err (!%p1186_p11)
}
  0x69   : > { %1040 = dma.hbm_to_vmem [thread:$0]  (!%p1431_p13), %s1438_s9, 256, %s1474_s13, %s1477_s26, %s1628_s30, %s1628_s30, %s1627_s14  }
  0x6a   : > { %p1629_p3 = scmp.ne.s32.totalorder %s1618_s25, 0 }
  0x6b   : > { %s1509_s12 = sand.u32 (!%p1629_p3), 1, %s1264_s16   ;;  %p1630_p6 = scmp.ne.s32.totalorder (!%p1629_p3), %s1616_s23, 0 }
  0x6c   : > { %243 = sbr.rel (%p1629_p3) target bundleno = 423 (0x1a7), region = 36  ;;  %s1512_s8 = sshll.u32 (!%p1629_p3), %s1509_s12, 4 }
  0x6d   : > { %s246_s5 = scalar_lea.sflag (!%p1629_p3), [#allocation4], %s1509_s12  ;;  %s249_s27 = scalar_lea.vmem (!%p1629_p3), [#allocation3], %s1512_s8 }
  0x73   : > { %1243 = dma.done.wait (%p1630_p6), %s246_s5, 256  }
  0x74   : > { %1245 = vsyncadd (%p1630_p6), %s246_s5, 4294967040  ;;  %s254_s25 = sand.u32 1, %s1346_s21   ;;  %s258_s9 = scalar_lea.vmem [#allocation6], %s1512_s8 }
  0x75   : > { %s255_s13 = scalar_lea.sflag [#allocation7], %s254_s25 }
  0x76   : > { %1247 = dma.done.wait (%p1630_p6), %s255_s13, 256  }
  0x77   : > { %1249 = vsyncadd (%p1630_p6), %s255_s13, 4294967040  ;;  %p1631_p13 = scmp.eq.s32.totalorder %s1346_s21, 0 }
  0x79   : > { %1251 = dma.done.wait (%p1631_p13), [#allocation7], 6144   ;;  %p1632_p0 = pmov %p1631_p13 }
  0x7a   : > { %v304_v0 = vld [vmem:[#allocation8] sm:$0xff]  ;;  %v305_v1 = vld [vmem:[#allocation8 + $0x8] sm:$0xff]  ;;  %v306_v2 = vld [vmem:[#allocation8 + $0x10] sm:$0xff]  ;;  %s291_s14 = scalar_lea.vmem [#allocation9], %s1512_s8  ;;  %s760_s26 = sshll.u32 %s1272_s18, 8 }
  0x7b   : > { %1253 = vsyncadd (%p1632_p0), [#allocation7], 4294961152  ;;  %v952_v3 = vpack.c.bf16 %v305_v1, %v304_v0  ;;  %v307_v4 = vld [vmem:[#allocation8 + $0x18] sm:$0xff]  ;;  %v308_v6 = vld [vmem:[#allocation8 + $0x20] sm:$0xff]  ;;  %s614_s30 = sshll.u32 %s291_s14, 4  ;;  %s1552_s10 = scalar_lea.hbm %s1605_s4, %s760_s26  ;;  %s1547_s30 = int_to_ptr.vmem [resolvable:$true] %s614_s30 }
  0x7c   : > { %v956_v5 = vpack.c.bf16 %v307_v4, %v306_v2  ;;  %v309_v7 = vld [vmem:[#allocation8 + $0x28] sm:$0xff]  ;;  %v310_v9 = vld [vmem:[#allocation8 + $0x30] sm:$0xff]  ;;  %v323_v10 = vld [vmem:[#allocation8 + $0x80] sm:$0xff]  ;;  %s599_s2 = scalar_lea.sflag [#allocation5], %s1509_s12  ;;  %s1190_s11 = scalar_lea.vmem %s1547_s30, 256 }
  0x7d   : > { %953 = vmatprep.subr.bf16.mxu0 %v952_v3  ;;  %v960_v8 = vpack.c.bf16 %v309_v7, %v308_v6  ;;  %v324_v11 = vld [vmem:[#allocation8 + $0x88] sm:$0xff]  ;;  %v311_v12 = vld [vmem:[#allocation8 + $0x38] sm:$0xff]  ;;  %v294_v14 = vld [vmem:[%s258_s9] sm:$0xff]  ;;  %p1191_p5 = scmp.ne.s32.totalorder %s1547_s30, %s1190_s11  ;;  %s1287_s18 = smov [#allocation9]  }
  0x7e   : > { %955 = vmatpush3.bf16.msra.mxu0 %v952_v3  ;;  %v920_v13 = vpack.c.bf16 %v324_v11, %v323_v10  ;;  %v297_v15 = vld [vmem:[%s249_s27] sm:$0xff]  ;;  %296 = vst [vmem:[#allocation2] sm:$0xff] %v294_v14  ;;  %v1536_v16 = vld [vmem:[%s249_s27 + $0x8] sm:$0xff]  ;;  %v964_v19 = vpack.c.bf16 %v311_v12, %v310_v9  ;;  %s1194_s22 = sshll.u32 %s1287_s18, 4  ;;  %s1195_s22 = int_to_ptr.vmem [resolvable:$false] %s1194_s22 }
  0x7f   : > { %957 = vmatprep.subr.bf16.mxu0 %v956_v5  ;;  %299 = vst [vmem:[#allocation2 + $0x8] sm:$0xff] %v297_v15  ;;  %v325_v17 = vld [vmem:[#allocation8 + $0x90] sm:$0xff]  ;;  %847 = vmatprep.mubr.f32.mxu1 %v297_v15  ;;  %300 = vst [vmem:[#allocation2 + $0x10] sm:$0xff] %v1536_v16  ;;  %v326_v18 = vld [vmem:[#allocation8 + $0x98] sm:$0xff]  ;;  %p1192_p9 = pnand %p1191_p5, %p1410_p10  ;;  %s1196_s0 = scalar_lea.vmem %s1195_s22, 512 }
  0x80   : > { %921 = vmatprep.subr.bf16.mxu1 %v920_v13  ;;  %v924_v20 = vpack.c.bf16 %v326_v18, %v325_v17  ;;  %v327_v21 = vld [vmem:[#allocation8 + $0xa0] sm:$0xff]  ;;  %v328_v22 = vld [vmem:[#allocation8 + $0xa8] sm:$0xff]  ;;  %v329_v26 = vld [vmem:[#allocation8 + $0xb0] sm:$0xff]  ;;  %p1197_p2 = scmp.lt.s32.totalorder %s1547_s30, %s1195_s22  ;;  %p1198_p7 = scmp.lt.s32.totalorder %s1196_s0, %s1190_s11 }
  0x81   : > { %923 = vmatpush3.bf16.msra.mxu1 %v920_v13  ;;  %v312_v23 = vld [vmem:[#allocation8 + $0x40] sm:$0xff]  ;;  %v313_v24 = vld [vmem:[#allocation8 + $0x48] sm:$0xff]  ;;  %v928_v25 = vpack.c.bf16 %v328_v22, %v327_v21  ;;  %v330_v27 = vld [vmem:[#allocation8 + $0xb8] sm:$0xff]  ;;  %p1193_p1 = pneg %p1192_p9 }
  0x82   : > { %959 = vmatpush3.bf16.msra.mxu0 %v956_v5  ;;  %925 = vmatprep.subr.bf16.mxu1 %v924_v20  ;;  %v968_v28 = vpack.c.bf16 %v313_v24, %v312_v23  ;;  %v314_v29 = vld [vmem:[#allocation8 + $0x50] sm:$0xff]  ;;  %v315_v30 = vld [vmem:[#allocation8 + $0x58] sm:$0xff]  ;;  %v932_v32 = vpack.c.bf16 %v330_v27, %v329_v26  ;;  %v331_v33 = vld [vmem:[#allocation8 + $0xc0] sm:$0xff]  ;;  %p1199_p4 = por %p1198_p7, %p1197_p2 }
  0x83   : > { %961 = vmatprep.subr.bf16.mxu0 %v960_v8  ;;  %v332_v34 = vld [vmem:[#allocation8 + $0xc8] sm:$0xff]  ;;  %v972_v35 = vpack.c.bf16 %v315_v30, %v314_v29  ;;  %v316_v36 = vld [vmem:[#allocation8 + $0x60] sm:$0xff]  ;;  %v333_v40 = vld [vmem:[#allocation8 + $0xd0] sm:$0xff] }
  0x84   : > { %v317_v37 = vld [vmem:[#allocation8 + $0x68] sm:$0xff]  ;;  %v936_v38 = vpack.c.bf16 %v332_v34, %v331_v33  ;;  %v334_v41 = vld [vmem:[#allocation8 + $0xd8] sm:$0xff]  ;;  %v318_v43 = vld [vmem:[#allocation8 + $0x70] sm:$0xff]  ;;  %p1200_p8 = pnand %p1199_p4, %p1193_p1 }
  0x85   : > { %927 = vmatpush3.bf16.msra.mxu1 %v924_v20  ;;  %v295_v39 = vld [vmem:[%s258_s9 + $0x8] sm:$0xff]  ;;  %v976_v42 = vpack.c.bf16 %v317_v37, %v316_v36  ;;  %v940_v45 = vpack.c.bf16 %v334_v41, %v333_v40  ;;  %v335_v46 = vld [vmem:[#allocation8 + $0xe0] sm:$0xff]  ;;  %v337_v52 = vld [vmem:[#allocation8 + $0xf0] sm:$0xff] }
  0x86   : > { %963 = vmatpush3.bf16.msra.mxu0 %v960_v8  ;;  %v302_v31 = vld [vmem:[#allocation2 + $0x7] sm:$0xff]  ;;  %929 = vmatprep.subr.bf16.mxu1 %v928_v25  ;;  %301 = vst [vmem:[#allocation2 + $0x18] sm:$0xff] %v295_v39  ;;  %v319_v44 = vld [vmem:[#allocation8 + $0x78] sm:$0xff]  ;;  %v494_v55 = vld [vmem:[#allocation8 + $0x110] sm:$0xff] }
  0x87   : > { %965 = vmatprep.subr.bf16.mxu0 %v964_v19  ;;  %882 = vmatprep.mubr.f32.mxu0 %v302_v31  ;;  %v336_v47 = vld [vmem:[#allocation8 + $0xe8] sm:$0xff]  ;;  %v980_v48 = vpack.c.bf16 %v319_v44, %v318_v43  ;;  %v492_v49 = vld [vmem:[#allocation8 + $0x100] sm:$0xff]  ;;  %v338_v53 = vld [vmem:[#allocation8 + $0xf8] sm:$0xff] }
  0x88   : > { %v493_v50 = vld [vmem:[#allocation8 + $0x108] sm:$0xff]  ;;  %v944_v51 = vpack.c.bf16 %v336_v47, %v335_v46  ;;  %v495_v56 = vld [vmem:[#allocation8 + $0x118] sm:$0xff]  ;;  %v948_v57 = vpack.c.bf16 %v338_v53, %v337_v52  ;;  %v496_v61 = vld [vmem:[#allocation8 + $0x120] sm:$0xff] }
  0x89   : > { %931 = vmatpush3.bf16.msra.mxu1 %v928_v25  ;;  %v984_v54 = vpack.c.bf16 %v493_v50, %v492_v49  ;;  %v303_v58 = vld [vmem:[#allocation2 + $0xf] sm:$0xff]  ;;  %v988_v59 = vpack.c.bf16 %v495_v56, %v494_v55  ;;  %v499_v1 = vld [vmem:[#allocation8 + $0x138] sm:$0xff]  ;;  %v500_v3 = vld [vmem:[#allocation8 + $0x140] sm:$0xff] }
  0x8a   : > { %967 = vmatpush3.bf16.msra.mxu0 %v964_v19  ;;  %933 = vmatprep.subr.bf16.mxu1 %v932_v32  ;;  %v489_v60 = vld [vmem:[#allocation2 + $0x9] sm:$0xff]  ;;  %v503_v7 = vld [vmem:[#allocation8 + $0x158] sm:$0xff]  ;;  %v504_v9 = vld [vmem:[#allocation8 + $0x160] sm:$0xff] }
  0x8b   : > { %969 = vmatprep.subr.bf16.mxu0 %v968_v28  ;;  %v497_v62 = vld [vmem:[#allocation8 + $0x128] sm:$0xff]  ;;  %v498_v0 = vld [vmem:[#allocation8 + $0x130] sm:$0xff]  ;;  %v507_v13 = vld [vmem:[#allocation8 + $0x178] sm:$0xff] }
  0x8c   : > { %v992_v63 = vpack.c.bf16 %v497_v62, %v496_v61  ;;  %v996_v2 = vpack.c.bf16 %v499_v1, %v498_v0  ;;  %v501_v4 = vld [vmem:[#allocation8 + $0x148] sm:$0xff]  ;;  %v502_v6 = vld [vmem:[#allocation8 + $0x150] sm:$0xff]  ;;  %v752_v19 = vld [vmem:[%s1604_s3] ss:$0 sm:$0xff] }
  0x8d   : > { %935 = vmatpush3.bf16.msra.mxu1 %v932_v32  ;;  %v1000_v5 = vpack.c.bf16 %v501_v4, %v500_v3  ;;  %v1004_v8 = vpack.c.bf16 %v503_v7, %v502_v6  ;;  %v505_v10 = vld [vmem:[#allocation8 + $0x168] sm:$0xff]  ;;  %v506_v12 = vld [vmem:[#allocation8 + $0x170] sm:$0xff] }
  0x8e   : > { %971 = vmatpush3.bf16.msra.mxu0 %v968_v28  ;;  %937 = vmatprep.subr.bf16.mxu1 %v936_v38  ;;  %v1008_v11 = vpack.c.bf16 %v505_v10, %v504_v9  ;;  %v1012_v14 = vpack.c.bf16 %v507_v13, %v506_v12  ;;  %v490_v15 = vld [vmem:[#allocation2 + $0x11] sm:$0xff] }
  0x8f   : > { %973 = vmatprep.subr.bf16.mxu0 %v972_v35 }
  0x91   : > { %939 = vmatpush3.bf16.msra.mxu1 %v936_v38 }
  0x92   : > { %975 = vmatpush3.bf16.msra.mxu0 %v972_v35  ;;  %941 = vmatprep.subr.bf16.mxu1 %v940_v45 }
  0x93   : > { %977 = vmatprep.subr.bf16.mxu0 %v976_v42 }
  0x95   : > { %943 = vmatpush3.bf16.msra.mxu1 %v940_v45 }
  0x96   : > { %979 = vmatpush3.bf16.msra.mxu0 %v976_v42  ;;  %945 = vmatprep.subr.bf16.mxu1 %v944_v51 }
  0x97   : > { %981 = vmatprep.subr.bf16.mxu0 %v980_v48 }
  0x99   : > { %947 = vmatpush3.bf16.msra.mxu1 %v944_v51 }
  0x9a   : > { %983 = vmatpush3.bf16.msra.mxu0 %v980_v48  ;;  %949 = vmatprep.subr.bf16.mxu1 %v948_v57 }
  0x9b   : > { %985 = vmatprep.subr.bf16.mxu0 %v984_v54 }
  0x9d   : > { %883 = vmatmul.mubr.f32.vlgmr.msra.gmra.mrb[0].mxu0 %v303_v58  ;;  %951 = vmatpush3.bf16.msra.mxu1 %v948_v57 }
  0x9e   : > { %987 = vmatpush3.bf16.msra.mxu0 %v984_v54  ;;  %917 = vmatprep.mubr.f32.mxu0 %v489_v60 }
  0x9f   : > { %989 = vmatprep.subr.bf16.mxu0 %v988_v59 }
  0xa0   : > { %848 = vmatmul.mubr.f32.vlgmr.msra.gmra.mrb[0].mxu1 %v1536_v16 }
  0xa2   : > { %991 = vmatpush3.bf16.msra.mxu0 %v988_v59 }
  0xa3   : > { %993 = vmatprep.subr.bf16.mxu0 %v992_v63 }
  0xa6   : > { %995 = vmatpush3.bf16.msra.mxu0 %v992_v63 }
  0xa7   : > { %997 = vmatprep.subr.bf16.mxu0 %v996_v2 }
  0xaa   : > { %999 = vmatpush3.bf16.msra.mxu0 %v996_v2 }
  0xab   : > { %1001 = vmatprep.subr.bf16.mxu0 %v1000_v5 }
  0xae   : > { %1003 = vmatpush3.bf16.msra.mxu0 %v1000_v5 }
  0xaf   : > { %1005 = vmatprep.subr.bf16.mxu0 %v1004_v8 }
  0xb2   : > { %1007 = vmatpush3.bf16.msra.mxu0 %v1004_v8 }
  0xb3   : > { %1009 = vmatprep.subr.bf16.mxu0 %v1008_v11 }
  0xb6   : > { %1011 = vmatpush3.bf16.msra.mxu0 %v1008_v11 }
  0xb7   : > { %1013 = vmatprep.subr.bf16.mxu0 %v1012_v14 }
  0xba   : > { %1015 = vmatpush3.bf16.msra.mxu0 %v1012_v14 }
  0xbd   : > { %918 = vmatmul.mubr.f32.vlgmr.msra.gmra.mrb[0].mxu0 %v490_v15 }
 0x173   : > { %v849_v16 = vpop.f32.mrb[0].mxu1 }
 0x174   : > { %v405_v17 = vpop.f32.mrb[1].mxu1 }
 0x190   : > { %v919_v18 = vpop.f32.mrb[0].mxu0 }
 0x191   : > { %v1016_v20 = vadd.f32 %v919_v18, %v849_v16  ;;  %v574_v21 = vpop.f32.mrb[1].mxu0 }
 0x192   : > { %v1017_v22 = vadd.f32 %v574_v21, %v405_v17 }
 0x193   : > { %v593_v23 = vadd.f32 %v1016_v20, %v752_v19 }
 0x194   : > { %v592_v24 = vadd.f32 %v1017_v22, %v752_v19 }
 0x195   : > { %v595_v25 = vmax.f32 %v593_v23, 0.0 }
 0x196   : > { %v594_v26 = vmax.f32 %v592_v24, 0.0 }
 0x197   : > { %597 = vst [vmem:[%s291_s14 + $0x8] sm:$0xff] %v595_v25 }
 0x198   : > { %596 = vst [vmem:[%s291_s14] sm:$0xff] %v594_v26 }
 0x199   : > { %1203 = shalt.err (!%p1200_p8)
}
 0x19a   : > { %s1204_s8 = scalar_lea.hbm %s1552_s10, 256  ;;  %s1208_s25 = scalar_lea.hbm %s1605_s4, 512 }
 0x19b   : > { %p1205_p12 = scmp.ne.s32.totalorder %s1552_s10, %s1204_s8  ;;  %p1209_p6 = scmp.lt.u32.totalorder %s1552_s10, %s1605_s4 }
 0x19c   : > { %p1210_p13 = scmp.lt.u32.totalorder %s1208_s25, %s1204_s8  ;;  %p1212_p5 = scmp.lt.u32.totalorder %s1204_s8, %s1552_s10 }
 0x19d   : > { %p1206_p11 = pnand %p1205_p12, %p1410_p10 }
 0x19e   : > { %p1211_p0 = por %p1210_p13, %p1209_p6 }
 0x19f   : > { %p1207_p3 = pneg %p1206_p11 }
 0x1a0   : > { %p1213_p9 = por %p1212_p5, %p1211_p0 }
 0x1a2   : > { %p1214_p1 = pnand %p1213_p9, %p1207_p3 }
 0x1a4   : > { %1217 = shalt.err (!%p1214_p1)
}
 0x1a5   : > { %s1288_s21 = smov 128   ;;  %s1289_s23 = smov 8  }
 0x1a6   : > { %1028 = dma.vmem_to_hbm [thread:$0]  (%p1410_p10), %s1547_s30, 256, %s1552_s10, %s599_s2, %s1288_s21, %s1288_s21, %s1289_s23  }
 0x1a7 PF: > { %s629_s14 = sand.u32 1, %s1260_s15   ;;  %p1633_p2 = scmp.ne.s32.totalorder %s1617_s24, 0 }
 0x1a8   : > { %p1634_p7 = scmp.ge.s32.totalorder %s1280_s20, 2  ;;  %s630_s26 = scalar_lea.sflag [#allocation5], %s629_s14 }
 0x1aa   : > { %p1042_p4 = pnand %p1634_p7, %p1633_p2 }
 0x1ac   : > { %1255 = dma.done.wait (!%p1042_p4), %s630_s26, 256  }
 0x1ad   : > { %1257 = vsyncadd (!%p1042_p4), %s630_s26, 4294967040  ;;  %s23_s20 = sadd.s32 1, %s1280_s20   ;;  %s1635_s28 = sld [smem:[#allocation14_spill]] }
 0x1ae   : > { %p20_p8 = scmp.ge.s32.totalorder %s23_s20, 4   ;;  %s1636_s15 = smov %s1264_s16 }
 0x1af   : > { %s1637_s16 = smov %s1268_s17  ;;  %s1638_s17 = smov %s1419_s7 }
 0x1b0   : > { %s1639_s18 = smov %s1276_s19  ;;  %22 = sbr.rel (!%p20_p8) target bundleno = 11 (0xb), region = 100 }
 0x1b3   : > { %s1640_s19 = smov %s1635_s28 }
 0x1b7   :  { %635 = vsyncpa [#allocation4], 1 }
 0x1b8   :  { %637 = vsyncpa [#allocation4 + $0x1], 1 }
 0x1b9   :  { %638 = vsyncpa [#allocation7], 1 }
 0x1ba   :  { %640 = vsyncpa [#allocation7 + $0x1], 1 }
 0x1bb   :  { %641 = vsyncpa [#allocation5], 1 }
 0x1bc   :  { %643 = vsyncpa [#allocation5 + $0x1], 1 }

</bundles_post_ra>
